<compile_context>
chip_gen: v6e
topology: v6e:2x2x1
jax: 0.10.0
libtpu: 0.0.40
codegen_flags: <defaults>
</compile_context>

<pallas_src>
import functools

import jax
import jax.numpy as jnp
from jax.experimental import pallas as pl
from jax.experimental.pallas import tpu as pltpu


def _round_up(n, m):
    return ((n + m - 1) // m) * m


def _cdiv(a, b):
    return -(-a // b)


def gpu_net_mlp_kernel(x_ref, w1_ref, b1_ref, w2_ref, b2_ref, w3_ref, b3_ref,
                       out_ref):
    """Fused MLP forward: relu(relu(x@W1+b1)@W2+b2)@W3+b3.

    x / W* are bf16 (MXU-native) with f32 accumulation; bias add + ReLU epilogue
    stays in f32 on the VPU. All feature dims are pre-padded to multiples of 128.
    """
    x = x_ref[...]                                                  # (TB, IN_P) bf16

    h1 = jnp.dot(x, w1_ref[...], preferred_element_type=jnp.float32)
    h1 = jnp.maximum(h1 + b1_ref[...], 0.0)

    h2 = jnp.dot(h1.astype(jnp.bfloat16), w2_ref[...],
                 preferred_element_type=jnp.float32)
    h2 = jnp.maximum(h2 + b2_ref[...], 0.0)

    y = jnp.dot(h2.astype(jnp.bfloat16), w3_ref[...],
                preferred_element_type=jnp.float32)
    out_ref[...] = (y + b3_ref[...]).astype(out_ref.dtype)          # lane-dense store


def prepare_params(params):
    """One-time pad (128-lane multiples) + bf16 cast of the gpu_net parameters.

    Call once outside the inference/training loop so the per-call path does not
    re-write padded weights to HBM. Returns (padded_param_tuple, out_features).
    """
    w1, b1, w2, b2, w3, b3 = params
    IN, H1 = w1.shape
    H2, OUT = w2.shape[1], w3.shape[1]
    IN_P, H1_P, H2_P, OUT_P = (_round_up(d, 128) for d in (IN, H1, H2, OUT))

    def pad2(a, rows, cols, dtype):
        out = jnp.zeros((rows, cols), dtype)
        return out.at[: a.shape[0], : a.shape[1]].set(a.astype(dtype))

    padded = (
        pad2(w1, IN_P, H1_P, jnp.bfloat16),
        pad2(b1, 1, H1_P, jnp.float32),
        pad2(w2, H1_P, H2_P, jnp.bfloat16),
        pad2(b2, 1, H2_P, jnp.float32),
        pad2(w3, H2_P, OUT_P, jnp.bfloat16),
        pad2(b3, 1, OUT_P, jnp.float32),
    )
    return padded, OUT


@functools.partial(jax.jit,
                   static_argnames=("out_features", "block_batch", "out_dtype"))
def gpu_net_forward(datas, padded_params, *, out_features, block_batch=512,
                    out_dtype=jnp.bfloat16):
    """Wrapper: fused Pallas MLP forward (== GPUNetTrainer.forward)."""
    w1_p, b1_p, w2_p, b2_p, w3_p, b3_p = padded_params
    B, IN = datas.shape
    IN_P, H1_P = w1_p.shape
    H2_P = w2_p.shape[1]
    OUT_P = w3_p.shape[1]

    # ---- VMEM-aware tiling --------------------------------------------------
    w_bytes = 2 * (IN_P * H1_P + H1_P * H2_P + H2_P * OUT_P)   # bf16, single-buffered
    b_bytes = 4 * (H1_P + H2_P + OUT_P)
    if w_bytes > (24 << 20):          # big models: shrink batch tile (v7x 64 MiB/TC)
        block_batch = min(block_batch, 256)

    # Minimize batch padding; bf16 packs (16,128) per vreg -> round tile to 16.
    n_tiles = max(1, _cdiv(B, block_batch))
    TB = _round_up(_cdiv(B, n_tiles), 16)
    B_P = _round_up(B, TB)
    grid = (B_P // TB,)

    out_itemsize = jnp.dtype(out_dtype).itemsize
    # Real footprint: weights once, x/out double-buffered, f32 + bf16 intermediates.
    footprint = (
        w_bytes + b_bytes
        + 2 * TB * IN_P * 2                    # x tiles (bf16, 2 buffers)
        + 2 * TB * OUT_P * out_itemsize        # out tiles (2 buffers)
        + TB * H1_P * (4 + 2)                  # h1 f32 + bf16 recast
        + TB * H2_P * (4 + 2)                  # h2 f32 + bf16 recast
    )
    vmem_limit = min(max(int(footprint * 1.5) + (4 << 20), 32 << 20), 64 << 20)

    # Pad x (fuses with the pallas_call under jit).
    x_p = jnp.zeros((B_P, IN_P), jnp.bfloat16).at[:B, :IN].set(
        datas.astype(jnp.bfloat16))

    # Weights/biases: constant block index + single buffer -> fetched once,
    # VMEM-resident across all batch tiles; only x/out stream per grid step.
    def resident(shape):
        return pl.BlockSpec(shape, lambda i: (0, 0), pipeline_mode=pl.Buffered(1))

    flops = 2 * B_P * (IN_P * H1_P + H1_P * H2_P + H2_P * OUT_P)
    bytes_accessed = (B_P * IN_P * 2 + w_bytes + b_bytes
                      + B_P * OUT_P * out_itemsize)

    out_padded = pl.pallas_call(
        gpu_net_mlp_kernel,
        out_shape=jax.ShapeDtypeStruct((B_P, OUT_P), out_dtype),
        grid=grid,
        in_specs=[
            pl.BlockSpec((TB, IN_P), lambda i: (i, 0)),   # x: streamed per tile
            resident((IN_P, H1_P)), resident((1, H1_P)),
            resident((H1_P, H2_P)), resident((1, H2_P)),
            resident((H2_P, OUT_P)), resident((1, OUT_P)),
        ],
        out_specs=pl.BlockSpec((TB, OUT_P), lambda i: (i, 0)),
        compiler_params=pltpu.CompilerParams(
            dimension_semantics=("parallel",),            # 2-TC sharding on v7x
            vmem_limit_bytes=vmem_limit,
        ),
        cost_estimate=pl.CostEstimate(
            flops=flops, transcendentals=0, bytes_accessed=bytes_accessed),
    )(x_p, w1_p, b1_p, w2_p, b2_p, w3_p, b3_p)

    # Strip batch / lane padding.
    return out_padded[:B, :out_features]


def init_params(key, in_features, hidden1, hidden2, out_features):
    """Deterministic synthetic f32 parameters (shapes implied by the MLP gpu_net)."""
    k1, k2, k3 = jax.random.split(key, 3)
    w1 = jax.random.normal(k1, (in_features, hidden1), jnp.float32) * 0.1
    b1 = jnp.zeros((1, hidden1), jnp.float32)
    w2 = jax.random.normal(k2, (hidden1, hidden2), jnp.float32) * 0.1
    b2 = jnp.zeros((1, hidden2), jnp.float32)
    w3 = jax.random.normal(k3, (hidden2, out_features), jnp.float32) * 0.1
    b3 = jnp.zeros((1, out_features), jnp.float32)
    return (w1, b1, w2, b2, w3, b3)


def reference_forward(datas, params):
    """Plain-JAX f32 reference of the same forward pass (sanity check)."""
    w1, b1, w2, b2, w3, b3 = params
    h1 = jnp.maximum(datas @ w1 + b1, 0.0)
    h2 = jnp.maximum(h1 @ w2 + b2, 0.0)
    return h2 @ w3 + b3


# TODO(synk): train_step (MSE loss backward + SGD/momentum update), scale_lr, save/load
# are optimizer/serialization glue, not forward-pass ops; only the gpu_net forward is
# kernelized.

if __name__ == "__main__":
    key = jax.random.PRNGKey(0)
    k_data, k_param = jax.random.split(key)

    batch, in_features, hidden1, hidden2, out_features = 8, 32, 64, 32, 4

    datas = jax.random.normal(k_data, (batch, in_features), jnp.float32)
    params = init_params(k_param, in_features, hidden1, hidden2, out_features)

    # One-time weight preparation (pad + bf16 cast) outside the call path.
    padded_params, out_f = prepare_params(params)

    pred = gpu_net_forward(datas, padded_params, out_features=out_f)
    pred = jax.block_until_ready(pred)

    ref = reference_forward(datas, params)
    assert pred.shape == (batch, out_features)
    # Tolerance: matmul inputs are bf16 and the default output dtype is bf16.
    assert jnp.allclose(pred.astype(jnp.float32), ref, atol=3e-2, rtol=5e-2)

    print("KERNEL_OK")
</pallas_src>

<mosaic_0001>
module attributes {stable_mosaic.version = 11 : i64} {
  func.func @gpu_net_mlp_kernel(%arg0: i32, %arg1: memref<16x128xbf16, #tpu.memory_space<vmem>>, %arg2: memref<128x128xbf16, #tpu.memory_space<vmem>>, %arg3: memref<1x128xf32, #tpu.memory_space<vmem>>, %arg4: memref<128x128xbf16, #tpu.memory_space<vmem>>, %arg5: memref<1x128xf32, #tpu.memory_space<vmem>>, %arg6: memref<128x128xbf16, #tpu.memory_space<vmem>>, %arg7: memref<1x128xf32, #tpu.memory_space<vmem>>, %arg8: memref<16x128xbf16, #tpu.memory_space<vmem>>) attributes {dimension_semantics = [#tpu.dimension_semantics<parallel>], iteration_bounds = array<i64: 1>, scalar_prefetch = 0 : i64, scratch_operands = 0 : i64, tpu.core_type = #tpu.core_type<tc>, window_params = [{transform_indices = @transform_0, window_bounds = array<i64: 16, 128>}, {pipeline_mode = #tpu.pipeline_mode<synchronous>, transform_indices = @transform_1, window_bounds = array<i64: 128, 128>}, {pipeline_mode = #tpu.pipeline_mode<synchronous>, transform_indices = @transform_2, window_bounds = array<i64: 1, 128>}, {pipeline_mode = #tpu.pipeline_mode<synchronous>, transform_indices = @transform_3, window_bounds = array<i64: 128, 128>}, {pipeline_mode = #tpu.pipeline_mode<synchronous>, transform_indices = @transform_4, window_bounds = array<i64: 1, 128>}, {pipeline_mode = #tpu.pipeline_mode<synchronous>, transform_indices = @transform_5, window_bounds = array<i64: 128, 128>}, {pipeline_mode = #tpu.pipeline_mode<synchronous>, transform_indices = @transform_6, window_bounds = array<i64: 1, 128>}, {transform_indices = @transform_7, window_bounds = array<i64: 16, 128>}]} {
    %c0 = arith.constant 0 : index
    %c0_0 = arith.constant 0 : index
    %0 = vector.load %arg1[%c0, %c0_0] : memref<16x128xbf16, #tpu.memory_space<vmem>>, vector<16x128xbf16>
    %c0_1 = arith.constant 0 : index
    %c0_2 = arith.constant 0 : index
    %1 = vector.load %arg2[%c0_1, %c0_2] : memref<128x128xbf16, #tpu.memory_space<vmem>>, vector<128x128xbf16>
    %cst = arith.constant dense<0.000000e+00> : vector<16x128xf32>
    %2 = tpu.matmul %0, %1, %cst {dimension_numbers = #tpu.dot_dimension_numbers<[1], [0], [0], [1], [0, 0, 1, 1], [], []>} : vector<16x128xbf16>, vector<128x128xbf16>, vector<16x128xf32> -> vector<16x128xf32>
    %c0_3 = arith.constant 0 : index
    %c0_4 = arith.constant 0 : index
    %3 = vector.load %arg3[%c0_3, %c0_4] : memref<1x128xf32, #tpu.memory_space<vmem>>, vector<1x128xf32>
    %4 = vector.broadcast %3 : vector<1x128xf32> to vector<16x128xf32>
    %5 = arith.addf %2, %4 : vector<16x128xf32>
    %cst_5 = arith.constant 0.000000e+00 : f32
    %6 = vector.broadcast %cst_5 : f32 to vector<16x128xf32>
    %7 = arith.maximumf %5, %6 : vector<16x128xf32>
    %8 = arith.truncf %7 : vector<16x128xf32> to vector<16x128xbf16>
    %c0_6 = arith.constant 0 : index
    %c0_7 = arith.constant 0 : index
    %9 = vector.load %arg4[%c0_6, %c0_7] : memref<128x128xbf16, #tpu.memory_space<vmem>>, vector<128x128xbf16>
    %cst_8 = arith.constant dense<0.000000e+00> : vector<16x128xf32>
    %10 = tpu.matmul %8, %9, %cst_8 {dimension_numbers = #tpu.dot_dimension_numbers<[1], [0], [0], [1], [0, 0, 1, 1], [], []>} : vector<16x128xbf16>, vector<128x128xbf16>, vector<16x128xf32> -> vector<16x128xf32>
    %c0_9 = arith.constant 0 : index
    %c0_10 = arith.constant 0 : index
    %11 = vector.load %arg5[%c0_9, %c0_10] : memref<1x128xf32, #tpu.memory_space<vmem>>, vector<1x128xf32>
    %12 = vector.broadcast %11 : vector<1x128xf32> to vector<16x128xf32>
    %13 = arith.addf %10, %12 : vector<16x128xf32>
    %cst_11 = arith.constant 0.000000e+00 : f32
    %14 = vector.broadcast %cst_11 : f32 to vector<16x128xf32>
    %15 = arith.maximumf %13, %14 : vector<16x128xf32>
    %16 = arith.truncf %15 : vector<16x128xf32> to vector<16x128xbf16>
    %c0_12 = arith.constant 0 : index
    %c0_13 = arith.constant 0 : index
    %17 = vector.load %arg6[%c0_12, %c0_13] : memref<128x128xbf16, #tpu.memory_space<vmem>>, vector<128x128xbf16>
    %cst_14 = arith.constant dense<0.000000e+00> : vector<16x128xf32>
    %18 = tpu.matmul %16, %17, %cst_14 {dimension_numbers = #tpu.dot_dimension_numbers<[1], [0], [0], [1], [0, 0, 1, 1], [], []>} : vector<16x128xbf16>, vector<128x128xbf16>, vector<16x128xf32> -> vector<16x128xf32>
    %c0_15 = arith.constant 0 : index
    %c0_16 = arith.constant 0 : index
    %19 = vector.load %arg7[%c0_15, %c0_16] : memref<1x128xf32, #tpu.memory_space<vmem>>, vector<1x128xf32>
    %20 = vector.broadcast %19 : vector<1x128xf32> to vector<16x128xf32>
    %21 = arith.addf %18, %20 : vector<16x128xf32>
    %22 = arith.truncf %21 : vector<16x128xf32> to vector<16x128xbf16>
    %c0_17 = arith.constant 0 : index
    %c0_18 = arith.constant 0 : index
    %23 = vector.load %arg8[%c0_17, %c0_18] : memref<16x128xbf16, #tpu.memory_space<vmem>>, vector<16x128xbf16>
    tpu.vector_store %arg8[%c0_17, %c0_18], %22 {strides = array<i32>} : memref<16x128xbf16, #tpu.memory_space<vmem>>, vector<16x128xbf16>,
    return
  }
  func.func @transform_0(%arg0: i32) -> (i32, i32) {
    %c0_i32 = arith.constant 0 : i32
    %c0_i32_0 = arith.constant 0 : i32
    return %arg0, %c0_i32 : i32, i32
  }
  func.func @transform_1(%arg0: i32) -> (i32, i32) {
    %c0_i32 = arith.constant 0 : i32
    %c0_i32_0 = arith.constant 0 : i32
    %c0_i32_1 = arith.constant 0 : i32
    return %c0_i32, %c0_i32_0 : i32, i32
  }
  func.func @transform_2(%arg0: i32) -> (i32, i32) {
    %c0_i32 = arith.constant 0 : i32
    %c0_i32_0 = arith.constant 0 : i32
    %c0_i32_1 = arith.constant 0 : i32
    return %c0_i32, %c0_i32_0 : i32, i32
  }
  func.func @transform_3(%arg0: i32) -> (i32, i32) {
    %c0_i32 = arith.constant 0 : i32
    %c0_i32_0 = arith.constant 0 : i32
    %c0_i32_1 = arith.constant 0 : i32
    return %c0_i32, %c0_i32_0 : i32, i32
  }
  func.func @transform_4(%arg0: i32) -> (i32, i32) {
    %c0_i32 = arith.constant 0 : i32
    %c0_i32_0 = arith.constant 0 : i32
    %c0_i32_1 = arith.constant 0 : i32
    return %c0_i32, %c0_i32_0 : i32, i32
  }
  func.func @transform_5(%arg0: i32) -> (i32, i32) {
    %c0_i32 = arith.constant 0 : i32
    %c0_i32_0 = arith.constant 0 : i32
    %c0_i32_1 = arith.constant 0 : i32
    return %c0_i32, %c0_i32_0 : i32, i32
  }
  func.func @transform_6(%arg0: i32) -> (i32, i32) {
    %c0_i32 = arith.constant 0 : i32
    %c0_i32_0 = arith.constant 0 : i32
    %c0_i32_1 = arith.constant 0 : i32
    return %c0_i32, %c0_i32_0 : i32, i32
  }
  func.func @transform_7(%arg0: i32) -> (i32, i32) {
    %c0_i32 = arith.constant 0 : i32
    %c0_i32_0 = arith.constant 0 : i32
    return %arg0, %c0_i32 : i32, i32
  }
}

</mosaic_0001>

<bundles_post_ra>
// kernel: gpu_net_forward.1
= control target key start
LH: loop header
LB: loop body
LE: loop exit
PB: predicated region body
PF: predicated region fallthrough
CT: control target
= control target key end

     0   :  { %12 = vsyncpa [#allocation3], 0  ;;  %s755_s0 = inlined_call_operand.vmem [shape: bf16[16,128], index: 0, kind: input, shape index: {}]   ;;  %s756_s1 = inlined_call_operand.hbm [shape: bf16[128,128], index: 1, kind: input, shape index: {}]   ;;  %s757_s2 = inlined_call_operand.vmem [shape: f32[1,128], index: 2, kind: input, shape index: {}]   ;;  %s758_s3 = inlined_call_operand.hbm [shape: bf16[128,128], index: 3, kind: input, shape index: {}]   ;;  %s759_s4 = inlined_call_operand.vmem [shape: f32[1,128], index: 4, kind: input, shape index: {}]   ;;  %s760_s5 = inlined_call_operand.hbm [shape: bf16[128,128], index: 5, kind: input, shape index: {}]   ;;  %s761_s6 = inlined_call_operand.vmem [shape: f32[1,128], index: 6, kind: input, shape index: {}]   ;;  %s762_s7 = inlined_call_operand.vmem [shape: bf16[16,128], index: 7, kind: output, shape index: {}]  }
   0x1   :  { %13 = vsyncpa [#allocation5], 0  ;;  %s654_s24 = smov [#allocation4]   ;;  %s655_s26 = smov [#allocation2]  }
   0x2   :  { %s35_s25 = sshll.u32 %s654_s24, 4  ;;  %s21_s27 = sshll.u32 %s655_s26, 4  ;;  %s36_s25 = int_to_ptr.vmem [resolvable:$true] %s35_s25  ;;  %s22_s27 = int_to_ptr.vmem [resolvable:$true] %s21_s27 }
   0x3   :  { %s598_s28 = scalar_lea.vmem %s36_s25, 1024  ;;  %p603_p1 = scmp.lt.s32.totalorder %s36_s25, %s36_s25 }
   0x4   :  { %p599_p0 = scmp.ne.s32.totalorder %s36_s25, %s598_s28  ;;  %p604_p2 = scmp.lt.s32.totalorder %s598_s28, %s598_s28 }
   0x6   :  { %p605_p3 = por %p604_p2, %p603_p1 }
   0x8   :  { %p606_p4 = pnand %p605_p3, %p599_p0 }
   0xa   :  { %609 = shalt.err (!%p606_p4)
}
   0xb   :  { %s656_s29 = smov 64   ;;  %s657_s30 = smov 4  }
   0xc   :  { %41 = dma.hbm_to_vmem [thread:$0]  %s758_s3, 1024, %s36_s25, [#allocation5], %s656_s29, %s656_s29, %s657_s30  }
   0xd   :  { %s618_s10 = scalar_lea.vmem %s22_s27, 1024  ;;  %p623_p6 = scmp.lt.s32.totalorder %s22_s27, %s22_s27 }
   0xe   :  { %p619_p5 = scmp.ne.s32.totalorder %s22_s27, %s618_s10  ;;  %p624_p7 = scmp.lt.s32.totalorder %s618_s10, %s618_s10 }
  0x10   :  { %p625_p8 = por %p624_p7, %p623_p6 }
  0x12   :  { %p626_p9 = pnand %p625_p8, %p619_p5 }
  0x14   :  { %629 = shalt.err (!%p626_p9)
}
  0x15   :  { %27 = dma.hbm_to_vmem [thread:$0]  %s756_s1, 1024, %s22_s27, [#allocation3], %s656_s29, %s656_s29, %s657_s30  }
  0x16   :  { %s658_s13 = smov [#allocation6]  }
  0x17   :  { %s49_s14 = sshll.u32 %s658_s13, 4  ;;  %s50_s14 = int_to_ptr.vmem [resolvable:$true] %s49_s14 }
  0x18   :  { %s638_s15 = scalar_lea.vmem %s50_s14, 1024  ;;  %p643_p11 = scmp.lt.s32.totalorder %s50_s14, %s50_s14 }
  0x19   :  { %p639_p10 = scmp.ne.s32.totalorder %s50_s14, %s638_s15  ;;  %p644_p12 = scmp.lt.s32.totalorder %s638_s15, %s638_s15 }
  0x1b   :  { %p645_p13 = por %p644_p12, %p643_p11 }
  0x1d   :  { %p646_p0 = pnand %p645_p13, %p639_p10 }
  0x1f   :  { %649 = shalt.err (!%p646_p0)
}
  0x20   :  { %55 = dma.hbm_to_vmem [thread:$0]  %s760_s5, 1024, %s50_s14, [#allocation5], %s656_s29, %s656_s29, %s657_s30  }
  0x21   :  { %650 = dma.done.wait [#allocation3], 1024  }
  0x22   :  { %651 = vsyncadd [#allocation3], 4294966272 }
  0x23   :  { %652 = dma.done.wait [#allocation5], 2048  }
  0x24   :  { %653 = vsyncadd [#allocation5], 4294965248  ;;  %v659_v0 = vmov 0.0   ;;  %vm660_vm0 = vmmov 0   ;;  %v565_v1 = vld [vmem:[#allocation2 + $0x38] sm:$0xff]   ;;  %v566_v2 = vld [vmem:[#allocation2 + $0x30] sm:$0xff]  }
  0x25   :  { %498 = vmatprep.subr.bf16.mxu0 %v659_v0  ;;  %514 = vmatprep.mubr.msk.bf16.mxu0 %vm660_vm0, %v659_v0  ;;  %v567_v3 = vld [vmem:[#allocation2 + $0x28] sm:$0xff]   ;;  %v574_v4 = vld [vmem:[#allocation4 + $0x38] sm:$0xff]   ;;  %v568_v5 = vld [vmem:[#allocation2 + $0x20] sm:$0xff]  }
  0x26   :  { %518 = vmatprep.subr.bf16.mxu1 %v659_v0  ;;  %534 = vmatprep.mubr.msk.bf16.mxu1 %vm660_vm0, %v659_v0  ;;  %v575_v6 = vld [vmem:[#allocation4 + $0x30] sm:$0xff]   ;;  %v569_v7 = vld [vmem:[#allocation2 + $0x18] sm:$0xff]   ;;  %v576_v8 = vld [vmem:[#allocation4 + $0x28] sm:$0xff]  }
  0x27   :  { %499 = vmatpush3.bf16.msra.mxu0 %v565_v1  ;;  %519 = vmatpush3.bf16.msra.mxu1 %v574_v4  ;;  %v570_v9 = vld [vmem:[#allocation2 + $0x10] sm:$0xff]   ;;  %v577_v10 = vld [vmem:[#allocation4 + $0x20] sm:$0xff]   ;;  %v571_v11 = vld [vmem:[#allocation2 + $0x8] sm:$0xff]  }
  0x28   :  { %500 = vmatprep.subr.bf16.mxu0 %v659_v0  ;;  %520 = vmatprep.subr.bf16.mxu1 %v659_v0  ;;  %v578_v12 = vld [vmem:[#allocation4 + $0x18] sm:$0xff]   ;;  %v572_v13 = vld [vmem:[#allocation2] sm:$0xff]   ;;  %v579_v15 = vld [vmem:[#allocation4 + $0x10] sm:$0xff]  }
  0x29   :  { %v573_v14 = vld [vmem:[%s755_s0] sm:$0xff]   ;;  %v580_v16 = vld [vmem:[#allocation4 + $0x8] sm:$0xff]   ;;  %v582_v18 = vld [vmem:[#allocation6 + $0x38] sm:$0xff]  }
  0x2a   :  { %v581_v17 = vld [vmem:[#allocation4] sm:$0xff]   ;;  %v583_v19 = vld [vmem:[#allocation6 + $0x30] sm:$0xff]   ;;  %v584_v20 = vld [vmem:[#allocation6 + $0x28] sm:$0xff]  }
  0x2b   :  { %501 = vmatpush3.bf16.msra.mxu0 %v566_v2  ;;  %521 = vmatpush3.bf16.msra.mxu1 %v575_v6  ;;  %v585_v21 = vld [vmem:[#allocation6 + $0x20] sm:$0xff]   ;;  %v586_v22 = vld [vmem:[#allocation6 + $0x18] sm:$0xff]   ;;  %v587_v33 = vld [vmem:[#allocation6 + $0x10] sm:$0xff]  }
  0x2c   :  { %502 = vmatprep.subr.bf16.mxu0 %v659_v0  ;;  %522 = vmatprep.subr.bf16.mxu1 %v659_v0  ;;  %v434_v23 = vld [vmem:[%s757_s2] ss:$0 sm:$0xff]  ;;  %v588_v34 = vld [vmem:[#allocation6 + $0x8] sm:$0xff]  }
  0x2d   :  { %v589_v35 = vld [vmem:[#allocation6] sm:$0xff]  }
  0x2e   :  { %v444_v36 = vld [vmem:[%s759_s4] ss:$0 sm:$0xff] }
  0x2f   :  { %503 = vmatpush3.bf16.msra.mxu0 %v567_v3  ;;  %523 = vmatpush3.bf16.msra.mxu1 %v576_v8  ;;  %v453_v47 = vld [vmem:[%s761_s6] ss:$0 sm:$0xff] }
  0x30   :  { %504 = vmatprep.subr.bf16.mxu0 %v659_v0  ;;  %524 = vmatprep.subr.bf16.mxu1 %v659_v0 }
  0x33   :  { %505 = vmatpush3.bf16.msra.mxu0 %v568_v5  ;;  %525 = vmatpush3.bf16.msra.mxu1 %v577_v10 }
  0x34   :  { %506 = vmatprep.subr.bf16.mxu0 %v659_v0  ;;  %526 = vmatprep.subr.bf16.mxu1 %v659_v0 }
  0x37   :  { %507 = vmatpush3.bf16.msra.mxu0 %v569_v7  ;;  %527 = vmatpush3.bf16.msra.mxu1 %v578_v12 }
  0x38   :  { %508 = vmatprep.subr.bf16.mxu0 %v659_v0  ;;  %528 = vmatprep.subr.bf16.mxu1 %v659_v0 }
  0x3b   :  { %509 = vmatpush3.bf16.msra.mxu0 %v570_v9  ;;  %529 = vmatpush3.bf16.msra.mxu1 %v579_v15 }
  0x3c   :  { %510 = vmatprep.subr.bf16.mxu0 %v659_v0  ;;  %530 = vmatprep.subr.bf16.mxu1 %v659_v0 }
  0x3f   :  { %511 = vmatpush3.bf16.msra.mxu0 %v571_v11  ;;  %531 = vmatpush3.bf16.msra.mxu1 %v580_v16 }
  0x40   :  { %512 = vmatprep.subr.bf16.mxu0 %v659_v0  ;;  %532 = vmatprep.subr.bf16.mxu1 %v659_v0 }
  0x43   :  { %513 = vmatpush3.bf16.msra.mxu0 %v572_v13  ;;  %533 = vmatpush3.bf16.msra.mxu1 %v581_v17 }
  0x44   :  { %538 = vmatprep.subr.bf16.mxu0 %v659_v0 }
  0x46   :  { %515 = vmatmul.mubr.bf16.vlgmr.msra.gmra.mxu0 %v573_v14 }
  0x47   :  { %554 = vmatprep.mubr.msk.bf16.mxu0 %vm660_vm0, %v659_v0  ;;  %539 = vmatpush3.bf16.msra.mxu0 %v582_v18 }
  0x48   :  { %540 = vmatprep.subr.bf16.mxu0 %v659_v0 }
  0x4b   :  { %541 = vmatpush3.bf16.msra.mxu0 %v583_v19 }
  0x4c   :  { %542 = vmatprep.subr.bf16.mxu0 %v659_v0 }
  0x4f   :  { %543 = vmatpush3.bf16.msra.mxu0 %v584_v20 }
  0x50   :  { %544 = vmatprep.subr.bf16.mxu0 %v659_v0 }
  0x53   :  { %545 = vmatpush3.bf16.msra.mxu0 %v585_v21 }
  0x54   :  { %546 = vmatprep.subr.bf16.mxu0 %v659_v0 }
  0x57   :  { %547 = vmatpush3.bf16.msra.mxu0 %v586_v22 }
  0x58   :  { %548 = vmatprep.subr.bf16.mxu0 %v659_v0 }
  0x5b   :  { %549 = vmatpush3.bf16.msra.mxu0 %v587_v33 }
  0x5c   :  { %550 = vmatprep.subr.bf16.mxu0 %v659_v0 }
  0x5f   :  { %551 = vmatpush3.bf16.msra.mxu0 %v588_v34 }
  0x60   :  { %552 = vmatprep.subr.bf16.mxu0 %v659_v0 }
  0x63   :  { %553 = vmatpush3.bf16.msra.mxu0 %v589_v35 }
 0x106   :  { %v181_v24 = vpop.f32.mrf.mxu0 }
 0x107   :  { %v182_v26 = vadd.f32 %v434_v23, %v181_v24 }
 0x108   :  { %v516_v25 = vpop.f32.mrf.mxu0 }
 0x109   :  { %v188_v30 = vmax.f32 %v182_v26, 0.0 }
 0x10a   :  { %v184_v27 = vpop.f32.mrf.mxu0 }
 0x10b   :  { %v185_v28 = vadd.f32 %v434_v23, %v184_v27 }
 0x10c   :  { %v517_v29 = vpop.f32.mrf.mxu0 }
 0x10d   :  { %v189_v31 = vmax.f32 %v185_v28, 0.0 }
 0x10f   :  { %v190_v32 = vpack.c.bf16 %v189_v31, %v188_v30 }
 0x111   :  { %535 = vmatmul.mubr.bf16.vlgmr.msra.gmra.mxu1 %v190_v32 }
 0x1d1   :  { %v296_v37 = vpop.f32.mrf.mxu1 }
 0x1d2   :  { %v297_v39 = vadd.f32 %v444_v36, %v296_v37 }
 0x1d3   :  { %v536_v38 = vpop.f32.mrf.mxu1 }
 0x1d4   :  { %v303_v43 = vmax.f32 %v297_v39, 0.0 }
 0x1d5   :  { %v299_v40 = vpop.f32.mrf.mxu1 }
 0x1d6   :  { %v300_v41 = vadd.f32 %v444_v36, %v299_v40 }
 0x1d7   :  { %v537_v42 = vpop.f32.mrf.mxu1 }
 0x1d8   :  { %v304_v44 = vmax.f32 %v300_v41, 0.0 }
 0x1da   :  { %v305_v45 = vpack.c.bf16 %v304_v44, %v303_v43 }
 0x1dc   :  { %555 = vmatmul.mubr.bf16.vlgmr.msra.gmra.mxu0 %v305_v45 }
 0x29c   :  { %v411_v46 = vpop.f32.mrf.mxu0 }
 0x29d   :  { %v412_v50 = vadd.f32 %v453_v47, %v411_v46 }
 0x29e   :  { %v556_v48 = vpop.f32.mrf.mxu0 }
 0x2a0   :  { %v414_v49 = vpop.f32.mrf.mxu0 }
 0x2a1   :  { %v415_v51 = vadd.f32 %v453_v47, %v414_v49 }
 0x2a2   :  { %v557_v52 = vpop.f32.mrf.mxu0 }
 0x2a3   :  { %v469_v53 = vpack.c.bf16 %v415_v51, %v412_v50 }
 0x2a5   :  { %470 = vst [vmem:[%s762_s7] sm:$0xff] %v469_v53  }
 0x2a6   :  { %432 = vsyncpa [#allocation3], 1 }
 0x2a7   :  { %433 = vsyncpa [#allocation5], 1 }

</bundles_post_ra>
